<compile_context>
chip_gen: v6e
topology: v6e:2x2x1
jax: 0.10.0
libtpu: 0.0.40
codegen_flags: <defaults>
</compile_context>

<pallas_src>
import functools

import jax
import jax.numpy as jnp
from jax import lax
from jax.experimental import pallas as pl
from jax.experimental.pallas import tpu as pltpu

C = 3
H = 16
W = 16
HW = H * W
B = 10            # the PyTorch loop builds 10 "distribution" samples
NUM_CLASSES = 16  # small stand-in for ResNet-101's 1000-way head
TARGET = 3

IMAGENET_MEAN = (0.485, 0.456, 0.406)
IMAGENET_STD = (0.229, 0.224, 0.225)


# ---------------------------------------------------------------------------
# Single fused Pallas kernel:
#   (folded normalize + grid_sample + GAP) -> linear head -> softmax -> mean.
# TODO(synk): pretrained ResNet-101 backbone has no clean in-script Pallas
# equivalent; replaced with a deterministic GAP + linear classifier that keeps
# the same output semantics (softmax over classes, take target column, mean).
# ---------------------------------------------------------------------------
def fused_kernel(x_ref, v_ref, p_ref, o_ref, *, target, inv_batch):
    """x_ref: (C, HW) raw image; v_ref: (B, HW) GAP-pullback vectors (lane-dense);
    p_ref: (NC, C+B) = [wt_eff | bias_eff] with ImageNet normalization folded in;
    o_ref: (1, 1) scalar result in SMEM."""
    x = x_ref[...]                                                   # (C, HW)
    v = v_ref[...]                                                   # (B, HW)

    # rawgap[c, b] = sum_p x[c, p] * v[b, p]: one K=256 MXU contraction with both
    # operands lane-dense (contract the last axis of each; no transposes).
    rawgap = lax.dot_general(x, v, (((1,), (1,)), ((), ())),
                             preferred_element_type=jnp.float32)     # (C, B)

    p = p_ref[...]
    wt = p[:, :C]                                                    # (NC, C)
    logits = p[:, C:]                                                # (NC, B) eff. bias
    # K=3 head contraction as three VPU broadcast FMAs (skip a second MXU pass).
    for c in range(C):
        logits = logits + wt[:, c:c + 1] * rawgap[c:c + 1, :]        # (NC, B)

    # softmax over classes (sublane axis); slice the target row before dividing
    # and use the EUP approximate reciprocal for the denominator.
    m = jnp.max(logits, axis=0, keepdims=True)
    e = jnp.exp(logits - m)
    denom = jnp.sum(e, axis=0, keepdims=True)                        # (1, B)
    row = e[target:target + 1, :]                                    # (1, B)
    prob = row * pl.reciprocal(denom, approx=True)                   # (1, B)
    o_ref[0, 0] = jnp.sum(prob) * inv_batch                          # scalar


def fused_forward(x_flat, v, params, target):
    kernel = functools.partial(fused_kernel, target=target, inv_batch=1.0 / B)
    flops = 2 * C * HW * B + 2 * NUM_CLASSES * C * B
    bytes_accessed = 4 * (C * HW + B * HW + NUM_CLASSES * (C + B) + 1)
    return pl.pallas_call(
        kernel,
        out_shape=jax.ShapeDtypeStruct((1, 1), jnp.float32),
        in_specs=[pl.BlockSpec(memory_space=pltpu.MemorySpace.VMEM)] * 3,
        out_specs=pl.BlockSpec(memory_space=pltpu.MemorySpace.SMEM),
        cost_estimate=pl.CostEstimate(flops=flops,
                                      transcendentals=NUM_CLASSES * B + B,
                                      bytes_accessed=bytes_accessed),
    )(x_flat, v, params)


# ---------------------------------------------------------------------------
# Host-side (XLA) helpers: bilinear taps for F.affine_grid/grid_sample
# (bilinear, zero padding) and the GAP pullback vectors.  Gather/one_hot +
# matmul formulation — no scatter-adds anywhere.
# ---------------------------------------------------------------------------
def bilinear_taps(A):
    """4 bilinear (index, weight) taps per output pixel for affine A acting on
    normalized output coords (x, y, 1)."""
    ys = 2.0 * (jnp.arange(H, dtype=jnp.float32) + 0.5) / H - 1.0
    xs = 2.0 * (jnp.arange(W, dtype=jnp.float32) + 0.5) / W - 1.0
    gy, gx = jnp.meshgrid(ys, xs, indexing="ij")                  # (H, W)
    sx = A[0, 0] * gx + A[0, 1] * gy + A[0, 2]
    sy = A[1, 0] * gx + A[1, 1] * gy + A[1, 2]
    px = ((sx + 1.0) * W - 1.0) / 2.0
    py = ((sy + 1.0) * H - 1.0) / 2.0
    x0 = jnp.floor(px); y0 = jnp.floor(py)
    x1 = x0 + 1.0;      y1 = y0 + 1.0
    wx1 = px - x0; wx0 = 1.0 - wx1
    wy1 = py - y0; wy0 = 1.0 - wy1

    def corner(xc, yc, wgt):
        valid = (xc >= 0) & (xc <= W - 1) & (yc >= 0) & (yc <= H - 1)
        xi = jnp.clip(xc, 0, W - 1).astype(jnp.int32)
        yi = jnp.clip(yc, 0, H - 1).astype(jnp.int32)
        idx = (yi * W + xi).reshape(-1)                           # (HW,)
        w = jnp.where(valid, wgt, 0.0).reshape(-1)                # (HW,)
        return idx, w

    cs = [corner(x0, y0, wx0 * wy0), corner(x1, y0, wx1 * wy0),
          corner(x0, y1, wx0 * wy1), corner(x1, y1, wx1 * wy1)]
    idx = jnp.stack([c[0] for c in cs], axis=1)                   # (HW, 4)
    wgt = jnp.stack([c[1] for c in cs], axis=1)                   # (HW, 4)
    return idx, wgt


def dense_resample_matrix(A):
    """Dense (HW, HW) resampling matrix M with img_out = M @ img_in, built via
    one_hot (gather) + a small contraction — no scatter-adds."""
    idx, wgt = bilinear_taps(A)                                   # (HW, 4)
    onehot = jax.nn.one_hot(idx, HW, dtype=jnp.float32)           # (HW, 4, HW)
    return jnp.einsum('ik,ikj->ij', wgt, onehot)                  # (HW, HW)


def affine_pair(s, th):
    a_scale = jnp.array([[1.0, 0.0, 0.0],
                         [0.0, 1.0, 0.0]], dtype=jnp.float32) * s
    c, sn = jnp.cos(th), jnp.sin(th)
    zero = jnp.zeros_like(c)
    # PyTorch code: R = [[c,-s],[s,c],[0,0]].T == [[c, s, 0], [-s, c, 0]]
    a_rot = jnp.stack([jnp.stack([c, sn, zero]),
                       jnp.stack([-sn, c, zero])])
    return a_scale, a_rot


def build_gap_vectors(scale_vals, thetas):
    """v_b with GAP(rotate_b(scale_b(img_c))) == img_c . v_b  (exact fold),
    returned lane-dense as (B, HW)."""
    u = jnp.full((HW,), 1.0 / HW, dtype=jnp.float32)

    def one(s, th):
        a_scale, a_rot = affine_pair(s, th)
        m_rot = dense_resample_matrix(a_rot)
        m_scale = dense_resample_matrix(a_scale)
        return (u @ m_rot) @ m_scale                              # (HW,)

    return jax.vmap(one)(scale_vals, thetas)                      # (B, HW)


@functools.partial(jax.jit, static_argnums=(1,))
def adversarial_net_forward(x, target, w, b, scale_vals, thetas):
    x_flat = x.reshape(C, HW).astype(jnp.float32)
    v = build_gap_vectors(scale_vals, thetas)                     # (B, HW)

    # Fold ImageNet normalization into the head so the kernel sees raw pixels:
    #   logits[n,b] = sum_c wt_eff[n,c]*rawgap[c,b] + bias_eff[n,b]
    mean = jnp.asarray(IMAGENET_MEAN, dtype=jnp.float32)          # (C,)
    inv_std = jnp.asarray([1.0 / s for s in IMAGENET_STD], dtype=jnp.float32)
    wt_eff = w.T * inv_std[None, :]                               # (NC, C)
    s_b = jnp.sum(v, axis=1)                                      # (B,) GAP mass
    bias_eff = b.reshape(NUM_CLASSES, 1) - (wt_eff @ mean)[:, None] * s_b[None, :]
    params = jnp.concatenate([wt_eff, bias_eff], axis=1)          # (NC, C+B)

    pred = fused_forward(x_flat, v, params, target)
    return pred[0, 0]


# ---------------------------------------------------------------------------
# Pure-JAX reference (un-folded dense per-sample resampling) for validation.
# ---------------------------------------------------------------------------
def reference_forward(x, target, w, b, scale_vals, thetas):
    mean = jnp.array(IMAGENET_MEAN, jnp.float32).reshape(C, 1, 1)
    std = jnp.array(IMAGENET_STD, jnp.float32).reshape(C, 1, 1)
    x_norm = ((x - mean) / std).reshape(C, HW)

    def one(s, th):
        a_scale, a_rot = affine_pair(s, th)
        m = dense_resample_matrix(a_rot) @ dense_resample_matrix(a_scale)
        return x_norm @ m.T                                       # (C, HW)

    images = jax.vmap(one)(scale_vals, thetas)                    # (B, C, HW)
    gap = jnp.mean(images, axis=-1)                               # (B, C)
    logits = gap @ w + b                                          # (B, NC)
    probs = jax.nn.softmax(logits, axis=-1)
    return jnp.mean(probs[:, target])


if __name__ == "__main__":
    jax.config.update("jax_default_matmul_precision", "highest")
    key = jax.random.PRNGKey(0)
    kx, ks, ka, kw, kb = jax.random.split(key, 5)
    x = jax.random.uniform(kx, (C, H, W), dtype=jnp.float32)
    # TODO(synk): deterministic stand-ins for python random.uniform(0.8, 1.2)
    # and random.randint(-30, 30) in the PyTorch forward.
    scale_vals = jax.random.uniform(ks, (B,), minval=0.8, maxval=1.2,
                                    dtype=jnp.float32)
    thetas = jnp.deg2rad(jax.random.randint(ka, (B,), -30, 31).astype(jnp.float32))
    # deterministic classifier parameters (stand-in for pretrained weights)
    w = 0.1 * jax.random.normal(kw, (C, NUM_CLASSES), dtype=jnp.float32)
    b = 0.01 * jax.random.normal(kb, (1, NUM_CLASSES), dtype=jnp.float32)

    pred = adversarial_net_forward(x, TARGET, w, b, scale_vals, thetas)
    jax.block_until_ready(pred)
    assert pred.shape == () and bool(jnp.isfinite(pred))

    ref = reference_forward(x, TARGET, w, b, scale_vals, thetas)
    # pl.reciprocal(approx=True) in the softmax denominator shifts numerics a
    # touch (EUP / bf16-grade approximation) -> slightly relaxed tolerance.
    assert jnp.allclose(pred, ref, rtol=1e-2, atol=1e-6), (pred, ref)
    print("KERNEL_OK")
</pallas_src>

<mosaic_0001>
module attributes {stable_mosaic.version = 11 : i64} {
  func.func @fused_kernel(%arg0: memref<3x256xf32, #tpu.memory_space<vmem>>, %arg1: memref<10x256xf32, #tpu.memory_space<vmem>>, %arg2: memref<16x13xf32, #tpu.memory_space<vmem>>, %arg3: memref<1x1xf32, #tpu.memory_space<smem>>) attributes {dimension_semantics = [], scalar_prefetch = 0 : i64, scratch_operands = 0 : i64, tpu.core_type = #tpu.core_type<tc>} {
    %c0 = arith.constant 0 : index
    %c0_0 = arith.constant 0 : index
    %0 = vector.load %arg0[%c0, %c0_0] : memref<3x256xf32, #tpu.memory_space<vmem>>, vector<3x256xf32>
    %c0_1 = arith.constant 0 : index
    %c0_2 = arith.constant 0 : index
    %1 = vector.load %arg1[%c0_1, %c0_2] : memref<10x256xf32, #tpu.memory_space<vmem>>, vector<10x256xf32>
    %cst = arith.constant dense<0.000000e+00> : vector<3x10xf32>
    %2 = tpu.matmul %0, %1, %cst {dimension_numbers = #tpu.dot_dimension_numbers<[1], [1], [0], [0], [0, 0, 1, 0], [], []>, precision = #tpu.contract_precision<fp32>} : vector<3x256xf32>, vector<10x256xf32>, vector<3x10xf32> -> vector<3x10xf32>
    %c0_3 = arith.constant 0 : index
    %c0_4 = arith.constant 0 : index
    %3 = vector.load %arg2[%c0_3, %c0_4] : memref<16x13xf32, #tpu.memory_space<vmem>>, vector<16x13xf32>
    %4 = vector.extract_strided_slice %3 {offsets = [0, 0], sizes = [16, 3], strides = [1, 1]} : vector<16x13xf32> to vector<16x3xf32>
    %5 = vector.extract_strided_slice %3 {offsets = [0, 3], sizes = [16, 10], strides = [1, 1]} : vector<16x13xf32> to vector<16x10xf32>
    %6 = vector.extract_strided_slice %4 {offsets = [0, 0], sizes = [16, 1], strides = [1, 1]} : vector<16x3xf32> to vector<16x1xf32>
    %7 = vector.extract_strided_slice %2 {offsets = [0, 0], sizes = [1, 10], strides = [1, 1]} : vector<3x10xf32> to vector<1x10xf32>
    %8 = vector.broadcast %6 : vector<16x1xf32> to vector<16x10xf32>
    %9 = vector.broadcast %7 : vector<1x10xf32> to vector<16x10xf32>
    %10 = arith.mulf %8, %9 : vector<16x10xf32>
    %11 = arith.addf %5, %10 : vector<16x10xf32>
    %12 = vector.extract_strided_slice %4 {offsets = [0, 1], sizes = [16, 1], strides = [1, 1]} : vector<16x3xf32> to vector<16x1xf32>
    %13 = vector.extract_strided_slice %2 {offsets = [1, 0], sizes = [1, 10], strides = [1, 1]} : vector<3x10xf32> to vector<1x10xf32>
    %14 = vector.broadcast %12 : vector<16x1xf32> to vector<16x10xf32>
    %15 = vector.broadcast %13 : vector<1x10xf32> to vector<16x10xf32>
    %16 = arith.mulf %14, %15 : vector<16x10xf32>
    %17 = arith.addf %11, %16 : vector<16x10xf32>
    %18 = vector.extract_strided_slice %4 {offsets = [0, 2], sizes = [16, 1], strides = [1, 1]} : vector<16x3xf32> to vector<16x1xf32>
    %19 = vector.extract_strided_slice %2 {offsets = [2, 0], sizes = [1, 10], strides = [1, 1]} : vector<3x10xf32> to vector<1x10xf32>
    %20 = vector.broadcast %18 : vector<16x1xf32> to vector<16x10xf32>
    %21 = vector.broadcast %19 : vector<1x10xf32> to vector<16x10xf32>
    %22 = arith.mulf %20, %21 : vector<16x10xf32>
    %23 = arith.addf %17, %22 : vector<16x10xf32>
    %cst_5 = arith.constant dense<0xFF800000> : vector<10xf32>
    %24 = vector.multi_reduction <maximumf>, %23, %cst_5 [0] : vector<16x10xf32> to vector<10xf32>
    %25 = vector.shape_cast %24 : vector<10xf32> to vector<1x10xf32>
    %26 = vector.broadcast %25 : vector<1x10xf32> to vector<16x10xf32>
    %27 = arith.subf %23, %26 : vector<16x10xf32>
    %28 = math.exp %27 : vector<16x10xf32>
    %cst_6 = arith.constant dense<0.000000e+00> : vector<10xf32>
    %29 = vector.multi_reduction <add>, %28, %cst_6 [0] : vector<16x10xf32> to vector<10xf32>
    %30 = vector.shape_cast %29 : vector<10xf32> to vector<1x10xf32>
    %31 = vector.extract_strided_slice %28 {offsets = [3, 0], sizes = [1, 10], strides = [1, 1]} : vector<16x10xf32> to vector<1x10xf32>
    %32 = tpu.reciprocal %30 {approx = true} : vector<1x10xf32> -> vector<1x10xf32>
    %33 = arith.mulf %31, %32 : vector<1x10xf32>
    %34 = vector.shape_cast %33 : vector<1x10xf32> to vector<1x1x10xf32>
    %cst_7 = arith.constant dense<0.000000e+00> : vector<1xf32>
    %35 = vector.multi_reduction <add>, %34, %cst_7 [1, 2] : vector<1x1x10xf32> to vector<1xf32>
    %36 = vector.shape_cast %35 : vector<1xf32> to vector<1x1x1xf32>
    %37 = vector.extract %36[0, 0, 0] : f32 from vector<1x1x1xf32>
    %cst_8 = arith.constant 1.000000e-01 : f32
    %38 = arith.mulf %37, %cst_8 : f32
    %c0_9 = arith.constant 0 : index
    %c0_10 = arith.constant 0 : index
    %39 = memref.load %arg3[%c0_9, %c0_10] : memref<1x1xf32, #tpu.memory_space<smem>>
    memref.store %38, %arg3[%c0_9, %c0_10] : memref<1x1xf32, #tpu.memory_space<smem>>
    return
  }
}

</mosaic_0001>

<bundles_post_ra>
// kernel: adversarial_net_forward.1
= control target key start
LH: loop header
LB: loop body
LE: loop exit
PB: predicated region body
PF: predicated region fallthrough
CT: control target
= control target key end

     0   :  { %v685_v8 = vmov 1   ;;  %v686_v16 = vmov 0   ;;  %s781_s0 = inlined_call_operand.vmem [shape: f32[3,256], index: 0, kind: input, shape index: {}]   ;;  %s782_s1 = inlined_call_operand.vmem [shape: f32[10,256], index: 1, kind: input, shape index: {}]   ;;  %s783_s2 = inlined_call_operand.vmem [shape: f32[16,13], index: 2, kind: input, shape index: {}]   ;;  %s784_s3 = inlined_call_operand.hbm [shape: f32[1,1], index: 3, kind: output, shape index: {}]  }
   0x1   :  { %v19_v0 = vld [vmem:[%s782_s1 + $0x18] sm:$0x3]  ;;  %v18_v1 = vld [vmem:[%s782_s1 + $0x10] sm:$0x3]  ;;  %v17_v2 = vld [vmem:[%s782_s1 + $0x8] sm:$0xff]  ;;  %665 = vset.pattern.permute.xlu1 %v685_v8  ;;  %664 = vset.pattern.permute.xlu0 %v686_v16 }
   0x2   :  { %v720_v3 = vand.u32 4294901760, %v19_v0  ;;  %v722_v4 = vand.u32 4294901760, %v18_v1  ;;  %v724_v5 = vand.u32 4294901760, %v17_v2  ;;  %v16_v6 = vld [vmem:[%s782_s1] sm:$0xff] }
   0x3   :  { %v15_v7 = vld [vmem:[%s781_s0] sm:$0x77]  ;;  %v732_v9 = vand.u32 4294901760, %v16_v6 }
   0x4   :  { %v21_v10 = vcombine.high %v15_v7, %v15_v7  ;;  %v734_v11 = vand.u32 4294901760, %v15_v7  ;;  %v739_v12 = vld [vmem:[%s783_s2] sm:$0xff]  ;;  %52 = vmatprep.subr.mxu0 %v720_v3  ;;  %v136_v13 = vsub.f32 %v19_v0, %v720_v3  ;;  %v142_v14 = vsub.f32 %v18_v1, %v722_v4 }
   0x5   :  { %v148_v15 = vsub.f32 %v17_v2, %v724_v5 }
   0x6   :  { %8 = vsyncpa [#allocation3], 0  ;;  %54 = vmatpush1.xpose.msra.mxu0 %v722_v4  ;;  %v91_v17 = vand.u32 4294901760, %v21_v10  ;;  %v98_v18 = vsub.f32 %v15_v7, %v734_v11  ;;  %v154_v19 = vsub.f32 %v16_v6, %v732_v9  ;;  %550 = vperm.xlu1 %665, %v739_v12   ;;  %v137_v20 = vand.u32 4294901760, %v136_v13  ;;  %v754_v23 = vld [vmem:[%s783_s2 + $0x8] sm:$0xff]  ;;  %s688_s2 = smov 3  }
   0x7   :  { %56 = vmatprep.subr.mxu0 %v724_v5  ;;  %v143_v21 = vand.u32 4294901760, %v142_v14  ;;  %v149_v22 = vand.u32 4294901760, %v148_v15  ;;  %525 = vperm.xlu0 %664, %v739_v12   ;;  %v687_v40 = vmov 2   ;;  %v533_v48 = vlaneseq  ;;  %s689_s24 = smov 125   ;;  %s690_s27 = smov [#allocation2]  }
   0x8   :  { %v92_v24 = vsub.f32 %v21_v10, %v91_v17  ;;  %v99_v25 = vand.u32 4294901760, %v98_v18  ;;  %v155_v26 = vand.u32 4294901760, %v154_v19  ;;  %192 = vmatprep.mubr.f32.mxu1 %v91_v17  ;;  %v138_v27 = vsub.f32 %v136_v13, %v137_v20 }
   0x9   :  { %v144_v28 = vsub.f32 %v142_v14, %v143_v21  ;;  %v150_v29 = vsub.f32 %v148_v15, %v149_v22  ;;  %v534_v53 = vshrl.u32 %v533_v48, 7  ;;  %vm597_vm0 = vcmask 105496  }
   0xa   :  { %58 = vmatpush1.xpose.msra.mxu0 %v732_v9  ;;  %v93_v30 = vand.u32 4294901760, %v92_v24  ;;  %v100_v31 = vsub.f32 %v98_v18, %v99_v25  ;;  %v156_v32 = vsub.f32 %v154_v19, %v155_v26  ;;  %554 = vperm.xlu1 %665, %v754_v23   ;;  %v139_v33 = vand.u32 4294901760, %v138_v27 }
   0xb   :  { %v145_v34 = vand.u32 4294901760, %v144_v28  ;;  %229 = vmatprep.subr.mxu0 %v136_v13  ;;  %v151_v35 = vand.u32 4294901760, %v150_v29  ;;  %530 = vperm.xlu0 %664, %v754_v23   ;;  %v535_v59 = vsub.s32 0, %v534_v53  ;;  %v559_v62 = vsub.s32 1, %v534_v53 }
   0xc   :  { %v94_v36 = vsub.f32 %v92_v24, %v93_v30  ;;  %140 = vmatprep.subr.mxu1 %v139_v33  ;;  %v101_v37 = vand.u32 4294901760, %v100_v31  ;;  %v157_v39 = vand.u32 4294901760, %v156_v32  ;;  %vm629_vm1 = vcmask 73728  }
   0xd   :  { %146 = vmatpush1.xpose.msra.mxu1 %v145_v34 }
   0xe   :  { %v95_v38 = vand.u32 4294901760, %v94_v36  ;;  %667 = vset.pattern.permute.xlu1 %v687_v40  ;;  %152 = vmatprep.subr.mxu1 %v151_v35 }
   0xf   :  { %666 = vset.pattern.permute.xlu0 %v687_v40  ;;  %578 = vperm.xlu1 %667, %v754_v23  }
  0x10   :  { %96 = vmatprep.mubr.f32.mxu0 %v95_v38  ;;  %574 = vperm.xlu0 %666, %v739_v12  }
  0x11   :  { %102 = vmatmul.mubr.f32.vlgmr.msra.gmra.mxu0 %v101_v37  ;;  %158 = vmatpush1.xpose.msra.mxu1 %v157_v39 }
  0x12   :  { %232 = vmatpush1.xpose.msra.mxu0 %v142_v14  ;;  %310 = vmatprep.subr.mxu1 %v720_v3 }
  0x13   :  { %235 = vmatprep.subr.mxu0 %v148_v15  ;;  %273 = vmatprep.mubr.f32.mxu0 %v92_v24 }
  0x14   :  { %194 = vmatmul.mubr.f32.vlgmr.msra.gmra.mxu1 %v734_v11 }
  0x15   :  { %312 = vmatpush1.xpose.msra.mxu1 %v722_v4  ;;  %352 = vmatprep.mubr.f32.mxu1 %v93_v30 }
  0x16   :  { %238 = vmatpush1.xpose.msra.mxu0 %v154_v19  ;;  %314 = vmatprep.subr.mxu1 %v724_v5 }
  0x17   :  { %392 = vmatprep.subr.mxu0 %v137_v20 }
  0x19   :  { %276 = vmatmul.mubr.f32.vlgmr.msra.gmra.mxu0 %v98_v18  ;;  %316 = vmatpush1.xpose.msra.mxu1 %v732_v9 }
  0x1a   :  { %396 = vmatpush1.xpose.msra.mxu0 %v143_v21  ;;  %474 = vmatprep.subr.mxu1 %v720_v3 }
  0x1b   :  { %400 = vmatprep.subr.mxu0 %v149_v22  ;;  %438 = vmatprep.mubr.f32.mxu0 %v91_v17 }
  0x1c   :  { %356 = vmatmul.mubr.f32.vlgmr.msra.gmra.mxu1 %v99_v25 }
  0x1d   :  { %476 = vmatpush1.xpose.msra.mxu1 %v722_v4  ;;  %514 = vmatprep.mubr.f32.mxu1 %v91_v17  ;;  %v583_v4 = vsub.s32 2, %v534_v53 }
  0x1e   :  { %404 = vmatpush1.xpose.msra.mxu0 %v155_v26  ;;  %478 = vmatprep.subr.mxu1 %v724_v5 }
  0x21   :  { %440 = vmatmul.mubr.f32.vlgmr.msra.gmra.mxu0 %v734_v11  ;;  %480 = vmatpush1.xpose.msra.mxu1 %v732_v9 }
  0x24   :  { %516 = vmatmul.mubr.f32.vlgmr.msra.gmra.mxu1 %v734_v11 }
  0x81   :  { %v551_v55 = vpop.permute.xlu1 %550 }
  0x82   :  { %v526_v56 = vpop.permute.xlu0 %525 }
  0x85   :  { %v555_v1 = vpop.permute.xlu1 %554 }
  0x86   :  { %v531_v2 = vpop.permute.xlu0 %530 }
  0x8a   :  { %v579_v10 = vpop.permute.xlu1 %578 }
  0x8b   :  { %v575_v11 = vpop.permute.xlu0 %574 }
  0xd1   :  { %v103_v41 = vpop.f32.mrf.mxu0 }
  0xd3   :  { %v105_v42 = vpop.f32.mrf.mxu0 }
  0xd4   :  { %v195_v43 = vpop.f32.mrf.mxu1 }
  0xd5   :  { %v196_v46 = vadd.f32 %v195_v43, %v103_v41 }
  0xd6   :  { %v197_v44 = vpop.f32.mrf.mxu1 }
  0xd9   :  { %v277_v45 = vpop.f32.mrf.mxu0 }
  0xda   :  { %v278_v50 = vadd.f32 %v277_v45, %v196_v46 }
  0xdb   :  { %v279_v47 = vpop.f32.mrf.mxu0 }
  0xdc   :  { %v357_v49 = vpop.f32.mrf.mxu1 }
  0xdd   :  { %v358_v52 = vadd.f32 %v357_v49, %v278_v50 }
  0xde   :  { %v359_v51 = vpop.f32.mrf.mxu1 }
  0xe1   :  { %v441_v54 = vpop.f32.mrf.mxu0 }
  0xe2   :  { %v442_v58 = vadd.f32 %v441_v54, %v358_v52 }
  0xe3   :  { %v443_v57 = vpop.f32.mrf.mxu0 }
  0xe4   :  { %v517_v60 = vpop.f32.mrf.mxu1 }
  0xe5   :  { %v518_v61 = vadd.f32 %v517_v60, %v442_v58 }
  0xe6   :  { %v519_v63 = vpop.f32.mrf.mxu1 }
  0xe7   :  { %v536_v0 = vrot.slane %v518_v61, %v535_v59  ;;  %v560_v3 = vrot.slane %v518_v61, %v559_v62  ;;  %v584_v7 = vrot.slane %v518_v61, %v583_v4 }
  0xe9   :  { %v538_v5 = vmul.f32 %v536_v0, %v531_v2  ;;  %v537_v6 = vmul.f32 %v536_v0, %v526_v56  ;;  %v562_v8 = vmul.f32 %v560_v3, %v555_v1  ;;  %v561_v9 = vmul.f32 %v560_v3, %v551_v55 }
  0xea   :  { %v586_v13 = vmul.f32 %v584_v7, %v579_v10  ;;  %v585_v14 = vmul.f32 %v584_v7, %v575_v11 }
  0xeb   :  { %543 = vrot.lane.b32.xlu0 %v538_v5, %s688_s2  ;;  %541 = vrot.lane.b32.xlu1 %v537_v6, %s688_s2 }
  0xef   :  { %567 = vrot.lane.b32.xlu0 %v562_v8, %s688_s2  ;;  %565 = vrot.lane.b32.xlu1 %v561_v9, %s688_s2 }
  0xf3   :  { %591 = vrot.lane.b32.xlu0 %v586_v13, %s688_s2  ;;  %589 = vrot.lane.b32.xlu1 %v585_v14, %s688_s2 }
 0x15d   :  { %v544_v15 = vpop.permute.xlu0 %543  ;;  %v542_v16 = vpop.permute.xlu1 %541 }
 0x15e   :  { %v548_v19 = vadd.f32 %v544_v15, %v754_v23  ;;  %v547_v20 = vadd.f32 %v542_v16, %v739_v12 }
 0x161   :  { %v568_v17 = vpop.permute.xlu0 %567  ;;  %v566_v18 = vpop.permute.xlu1 %565 }
 0x162   :  { %v572_v21 = vadd.f32 %v568_v17, %v548_v19  ;;  %v571_v22 = vadd.f32 %v566_v18, %v547_v20 }
 0x165   :  { %v592_v24 = vpop.permute.xlu0 %591  ;;  %v590_v25 = vpop.permute.xlu1 %589 }
 0x166   :  { %v596_v26 = vadd.f32 %v592_v24, %v572_v21  ;;  %v595_v27 = vadd.f32 %v590_v25, %v571_v22 }
 0x168   :  { %v599_v28 = vsel %vm597_vm0, %v596_v26, -inf  ;;  %v598_v29 = vsel %vm597_vm0, %v595_v27, -inf }
 0x169   :  { %v600_v30 = vmax.f32 %v598_v29, %v599_v28 }
 0x16b   :  { %v601_v31 = vrot.slane %v600_v30, 4 }
 0x16d   :  { %v602_v32 = vmax.f32 %v600_v30, %v601_v31 }
 0x16f   :  { %v603_v33 = vrot.slane %v602_v32, 2 }
 0x171   :  { %v604_v34 = vmax.f32 %v602_v32, %v603_v33 }
 0x173   :  { %v605_v35 = vrot.slane %v604_v34, 1 }
 0x175   :  { %v606_v23 = vmax.f32 %v604_v34, %v605_v35 }
 0x177   :  { %v607_v36 = vsub.f32 %v595_v27, %v606_v23  ;;  %v608_v12 = vsub.f32 %v596_v26, %v606_v23 }
 0x179   :  { %v609_v37 = vmul.f32 1.442695, %v607_v36  ;;  %v611_v38 = vmul.f32 1.442695, %v608_v12 }
 0x17b   :  { %669 = vpow2.f32 %v609_v37 }
 0x17c   :  { %671 = vpow2.f32 %v611_v38 }
 0x188   :  { %v670_v39 = vpop.eup %669 }
 0x189   :  { %v672_v40 = vpop.eup %671  ;;  %v613_v41 = vsel %vm597_vm0, %v670_v39, 0.0 }
 0x18a   :  { %v614_v42 = vsel %vm597_vm0, %v672_v40, 0.0 }
 0x18b   :  { %v615_v43 = vadd.f32 %v614_v42, %v613_v41 }
 0x18d   :  { %v616_v44 = vrot.slane %v615_v43, 4 }
 0x18f   :  { %v617_v45 = vadd.f32 %v616_v44, %v615_v43 }
 0x191   :  { %v618_v46 = vrot.slane %v617_v45, 2 }
 0x193   :  { %v619_v47 = vadd.f32 %v618_v46, %v617_v45 }
 0x195   :  { %v620_v48 = vrot.slane %v619_v47, 1 }
 0x197   :  { %v621_v49 = vadd.f32 %v620_v48, %v619_v47 }
 0x199   :  { %673 = vrcp.f32 %v621_v49 }
 0x1a6   :  { %v674_v50 = vpop.eup %673 }
 0x1a7   :  { %v623_v51 = vmul.f32 %v674_v50, %v670_v39 }
 0x1a9   :  { %v625_v52 = vrot.slane %v623_v51, 3 }
 0x1ab   :  { %626 = vrot.lane.b32.xlu1 %v625_v52, %s689_s24 }
 0x21d   :  { %v627_v53 = vpop.permute.xlu1 %626 }
 0x21e   :  { %v630_v54 = vsel %vm629_vm1, %v627_v53, 0.0 }
 0x21f   :  { %631 = vadd.xlane.f32.xlu0 %v630_v54 }
 0x2a8   :  { %v632_v55 = vpop.xlane.xlu0 %631 }
 0x2a9   :  { %v633_v56 = vrot.slane %v632_v55, 4 }
 0x2ab   :  { %v634_v57 = vadd.f32 %v633_v56, %v632_v55 }
 0x2ad   :  { %v635_v58 = vrot.slane %v634_v57, 2 }
 0x2af   :  { %v636_v59 = vadd.f32 %v635_v58, %v634_v57 }
 0x2b1   :  { %v637_v60 = vrot.slane %v636_v59, 1 }
 0x2b3   :  { %v638_v61 = vadd.f32 %v637_v60, %v636_v59 }
 0x2b5   :  { %656 = vpush %v638_v61 }
 0x2e6   :  { %s657_s25 = spop %656 }
 0x2e7   :  { %s640_s26 = smul.f32 0.1, %s657_s25 }
 0x2e9   :  { %642 = sst [smem:[#allocation2]] %s640_s26 }
 0x2ea   :  { %650 = dma.smem_to_hbm %s690_s27, 16, %s784_s3, [#allocation3]  }
 0x2eb   :  { %683 = dma.done.wait [#allocation3], 16  }
 0x2ec   :  { %684 = vsyncadd [#allocation3], 4294967280 }
 0x2ed   :  { %654 = sfence }
 0x2ee   :  { %655 = vsyncpa [#allocation3], 1 }

</bundles_post_ra>
